<compile_context>
chip_gen: v6e
topology: v6e:2x2x1
jax: 0.10.0
libtpu: 0.0.40
codegen_flags: <defaults>
</compile_context>

<pallas_src>
import functools

import jax
import jax.numpy as jnp
from jax.experimental import pallas as pl
from jax.experimental.pallas import tpu as pltpu


_MIN_GRID_STEPS = 4                      # >= 4 pipelined steps: DMA overlap + v7x 2-TC sharding
_FOLD_LANE_CANDIDATES = (1024, 512, 256, 128)


@functools.lru_cache(maxsize=None)
def _hw_budgets():
    """(vmem_limit_bytes, per-block in+out byte budget), generation aware."""
    try:
        vmem = int(pltpu.get_tpu_info().vmem_capacity_bytes)
    except Exception:                     # conservative (v7x-sized) fallback
        vmem = 64 * 1024 * 1024
    vmem_limit = min(max(vmem // 2, 32 * 1024 * 1024), 64 * 1024 * 1024)
    block_budget = min(vmem_limit // 4, 16 * 1024 * 1024)   # double-buffered blocks fit easily
    return vmem_limit, block_budget


def _compiler_params():
    vmem_limit, _ = _hw_budgets()
    return pltpu.CompilerParams(
        dimension_semantics=("parallel",),
        vmem_limit_bytes=vmem_limit,
    )


def _row_quantum(itemsizes):
    # sublane quantum: 8 rows for 4-byte dtypes, 16 for 2-byte, 32 for 1-byte
    return max(8 * (4 // max(1, min(int(s), 4))) for s in itemsizes)


def _fold_dims(H, W):
    """Fold the pixel space into a lane-dense (rows, lanes) layout.

    If W is already a multiple of 128 keep (H, W); otherwise pick L (a multiple
    of 128 dividing H*W) so output stores are unmasked full-lane vst's.  Falls
    back to (H, W) (masked stores) when no such L exists.
    """
    if W % 128 == 0:
        return H, W
    pixels = H * W
    for L in _FOLD_LANE_CANDIDATES:
        if pixels % L == 0:
            return pixels // L, L
    return H, W


def _pick_tile_rows(R, row_bytes, quantum, tile_rows=None):
    """Row-tile size: largest multiple of the sublane quantum within the VMEM
    block budget, additionally capped so the grid has >= _MIN_GRID_STEPS steps
    whenever the image is big enough."""
    _, budget = _hw_budgets()
    if tile_rows is not None:
        tr = max(quantum, (int(tile_rows) // quantum) * quantum)   # round to quantum
        return min(tr, R)
    tr = max(quantum, (budget // max(int(row_bytes), 1)) // quantum * quantum)
    target = pl.cdiv(R, _MIN_GRID_STEPS)
    target = max(quantum, pl.cdiv(target, quantum) * quantum)      # round up to quantum
    tr = min(tr, target)
    return min(tr, R)


def _make_unpack_kernel(num_channels, out_dtype):
    def kernel(x_ref, o_ref):
        x = x_ref[...]                                  # (tR, L) int32, packed bytes
        for c in range(num_channels):                   # static unroll, C <= 4
            byte = (x >> (8 * c)) & 0xFF                # VPU shift + mask -> 0..255
            o_ref[c, :, :] = byte.astype(out_dtype)     # per-channel cast, no /255
    return kernel


def _cast_kernel(x_ref, o_ref):
    o_ref[...] = x_ref[...].astype(o_ref.dtype)


def _to_tensor_packed_u8(image, out_dtype, tile_rows):
    """uint8 HWC with 2 <= C <= 4: fused HWC->CHW de-interleave + cast."""
    H, W, C = image.shape
    if C == 4:
        # Zero-copy reinterpretation: bitcast_convert_type maps minor-dim
        # element 0 to the least-significant byte (numpy little-endian .view
        # semantics), so channel c sits at bits [8c, 8c+8).
        packed = jax.lax.bitcast_convert_type(image, jnp.int32)     # (H, W) int32
    else:
        # Single elementwise XLA fusion (no jnp.pad HBM round trip): pack the
        # C interleaved bytes into one little-endian int32 word per pixel.
        packed = image[..., 0].astype(jnp.int32)
        for c in range(1, C):
            packed = packed | (image[..., c].astype(jnp.int32) << (8 * c))

    R, L = _fold_dims(H, W)
    packed = packed.reshape(R, L)                       # free row-major reshape

    out_size = jnp.dtype(out_dtype).itemsize
    row_bytes = L * 4 + C * L * out_size
    tr = _pick_tile_rows(R, row_bytes, _row_quantum((4, out_size)), tile_rows)
    grid = (pl.cdiv(R, tr),)

    out = pl.pallas_call(
        _make_unpack_kernel(C, out_dtype),
        out_shape=jax.ShapeDtypeStruct((C, R, L), out_dtype),
        grid=grid,
        in_specs=[pl.BlockSpec((tr, L), lambda i: (i, 0))],
        out_specs=pl.BlockSpec((C, tr, L), lambda i: (0, i, 0)),
        compiler_params=_compiler_params(),
    )(packed)
    return out.reshape(C, H, W)                         # free row-major reshape


def _to_tensor_cast_chw(chw, out_dtype, tile_rows):
    """CHW uint8 input: tiled lane-dense elementwise cast to float32."""
    C, H, W = chw.shape
    R, L = _fold_dims(H, W)
    x = chw.reshape(C, R, L)                            # free row-major reshape

    in_size = jnp.dtype(chw.dtype).itemsize
    out_size = jnp.dtype(out_dtype).itemsize
    row_bytes = C * L * (in_size + out_size)
    tr = _pick_tile_rows(R, row_bytes, _row_quantum((in_size, out_size)), tile_rows)
    grid = (pl.cdiv(R, tr),)

    out = pl.pallas_call(
        _cast_kernel,
        out_shape=jax.ShapeDtypeStruct((C, R, L), out_dtype),
        grid=grid,
        in_specs=[pl.BlockSpec((C, tr, L), lambda i: (0, i, 0))],
        out_specs=pl.BlockSpec((C, tr, L), lambda i: (0, i, 0)),
        compiler_params=_compiler_params(),
    )(x)
    return out.reshape(C, H, W)


def to_tensor_no_div(image, tile_rows=None):
    """Pallas equivalent of ToTensorNoDiv.forward (ndarray branch)."""
    if image.ndim == 2:
        image = image[:, :, None]                       # HW -> HWC
    assert image.ndim == 3, "expected an HWC image"
    H, W, C = image.shape

    if image.dtype != jnp.uint8:
        # Pure permute, dtype preserved: skip the kernel (no extra HBM pass).
        return jnp.transpose(image, (2, 0, 1))

    out_dtype = jnp.float32                             # default float dtype, no /255

    if 2 <= C <= 4:
        # Fused path: HWC -> CHW de-interleave + cast entirely inside one kernel.
        return _to_tensor_packed_u8(image, out_dtype, tile_rows)

    # C == 1: the HWC->CHW permute is a free reshape; single fused cast pass.
    # C > 4: XLA transpose + Pallas cast (see TODO(synk) in the header).
    chw = jnp.transpose(image, (2, 0, 1))
    return _to_tensor_cast_chw(chw, out_dtype, tile_rows)


if __name__ == "__main__":
    key = jax.random.PRNGKey(0)
    k0, k1, k2, k3, k4 = jax.random.split(key, 5)

    def ref_to_tensor(img):
        if img.ndim == 2:
            img = img[:, :, None]
        chw = jnp.transpose(img, (2, 0, 1))
        return chw.astype(jnp.float32) if img.dtype == jnp.uint8 else chw

    # 1) RGBA uint8 (96x128): lane-aligned W, auto-tiling yields a >=4-step
    #    "parallel" grid (pipeline overlap / dual-TC sharding), bitcast fast path.
    img_rgba = jax.random.randint(k0, (96, 128, 4), 0, 256, dtype=jnp.int32).astype(jnp.uint8)
    out4 = jax.block_until_ready(to_tensor_no_div(img_rgba))
    assert out4.shape == (4, 96, 128) and out4.dtype == jnp.float32, (out4.shape, out4.dtype)
    assert bool(jnp.all(out4 == ref_to_tensor(img_rgba))), "uint8 C=4 mismatch"

    # 2) RGB uint8 (64x96): W % 128 != 0 -> folded lane-dense layout, explicit
    #    little-endian pack path (no jnp.pad HBM round trip).
    img_rgb = jax.random.randint(k1, (64, 96, 3), 0, 256, dtype=jnp.int32).astype(jnp.uint8)
    out3 = jax.block_until_ready(to_tensor_no_div(img_rgb))
    assert out3.shape == (3, 64, 96) and out3.dtype == jnp.float32
    assert bool(jnp.all(out3 == ref_to_tensor(img_rgb))), "uint8 C=3 mismatch"

    # 3) RGBA uint8 with awkward dims (40x160): folds to (25, 256) rows/lanes and
    #    the row count is not a tile multiple -> exercises the partial last block.
    img_odd = jax.random.randint(k2, (40, 160, 4), 0, 256, dtype=jnp.int32).astype(jnp.uint8)
    out_odd = jax.block_until_ready(to_tensor_no_div(img_odd))
    assert out_odd.shape == (4, 40, 160)
    assert bool(jnp.all(out_odd == ref_to_tensor(img_odd))), "uint8 odd-shape mismatch"

    # 4) Grayscale 2-D uint8 (64x128): free channel reshape + tiled cast kernel;
    #    explicit tile_rows override is rounded to the uint8 sublane quantum.
    gray = jax.random.randint(k3, (64, 128), 0, 256, dtype=jnp.int32).astype(jnp.uint8)
    out_g = jax.block_until_ready(to_tensor_no_div(gray, tile_rows=32))
    assert out_g.shape == (1, 64, 128) and out_g.dtype == jnp.float32
    assert bool(jnp.all(out_g == ref_to_tensor(gray))), "grayscale mismatch"

    # 5) Non-uint8 input: permute only, dtype preserved, no kernel launched.
    img_f32 = jax.random.normal(k4, (16, 16, 3), dtype=jnp.float32)
    out_f = jax.block_until_ready(to_tensor_no_div(img_f32))
    assert out_f.shape == (3, 16, 16) and out_f.dtype == jnp.float32
    assert bool(jnp.all(out_f == ref_to_tensor(img_f32))), "float32 pass-through mismatch"

    print("KERNEL_OK")
</pallas_src>

<mosaic_0001>
module attributes {stable_mosaic.version = 11 : i64} {
  func.func @kernel(%arg0: i32, %arg1: memref<24x128xi32, #tpu.memory_space<vmem>>, %arg2: memref<4x24x128xf32, #tpu.memory_space<vmem>>) attributes {dimension_semantics = [#tpu.dimension_semantics<parallel>], iteration_bounds = array<i64: 4>, scalar_prefetch = 0 : i64, scratch_operands = 0 : i64, tpu.core_type = #tpu.core_type<tc>, window_params = [{transform_indices = @transform_0, window_bounds = array<i64: 24, 128>}, {transform_indices = @transform_1, window_bounds = array<i64: 4, 24, 128>}]} {
    %c0 = arith.constant 0 : index
    %c0_0 = arith.constant 0 : index
    %0 = vector.load %arg1[%c0, %c0_0] : memref<24x128xi32, #tpu.memory_space<vmem>>, vector<24x128xi32>
    %c0_i32 = arith.constant 0 : i32
    %1 = vector.broadcast %c0_i32 : i32 to vector<24x128xi32>
    %2 = arith.shrsi %0, %1 : vector<24x128xi32>
    %c255_i32 = arith.constant 255 : i32
    %3 = vector.broadcast %c255_i32 : i32 to vector<24x128xi32>
    %4 = arith.andi %2, %3 : vector<24x128xi32>
    %5 = arith.sitofp %4 : vector<24x128xi32> to vector<24x128xf32>
    %c0_1 = arith.constant 0 : index
    %c0_2 = arith.constant 0 : index
    %c0_3 = arith.constant 0 : index
    %6 = vector.load %arg2[%c0_1, %c0_2, %c0_3] : memref<4x24x128xf32, #tpu.memory_space<vmem>>, vector<1x24x128xf32>
    %7 = vector.shape_cast %6 : vector<1x24x128xf32> to vector<24x128xf32>
    %8 = vector.shape_cast %5 : vector<24x128xf32> to vector<1x24x128xf32>
    tpu.vector_store %arg2[%c0_1, %c0_2, %c0_3], %8 {strides = array<i32>} : memref<4x24x128xf32, #tpu.memory_space<vmem>>, vector<1x24x128xf32>,
    %c8_i32 = arith.constant 8 : i32
    %9 = vector.broadcast %c8_i32 : i32 to vector<24x128xi32>
    %10 = arith.shrsi %0, %9 : vector<24x128xi32>
    %c255_i32_4 = arith.constant 255 : i32
    %11 = vector.broadcast %c255_i32_4 : i32 to vector<24x128xi32>
    %12 = arith.andi %10, %11 : vector<24x128xi32>
    %13 = arith.sitofp %12 : vector<24x128xi32> to vector<24x128xf32>
    %c1 = arith.constant 1 : index
    %c0_5 = arith.constant 0 : index
    %c0_6 = arith.constant 0 : index
    %14 = vector.load %arg2[%c1, %c0_5, %c0_6] : memref<4x24x128xf32, #tpu.memory_space<vmem>>, vector<1x24x128xf32>
    %15 = vector.shape_cast %14 : vector<1x24x128xf32> to vector<24x128xf32>
    %16 = vector.shape_cast %13 : vector<24x128xf32> to vector<1x24x128xf32>
    tpu.vector_store %arg2[%c1, %c0_5, %c0_6], %16 {strides = array<i32>} : memref<4x24x128xf32, #tpu.memory_space<vmem>>, vector<1x24x128xf32>,
    %c16_i32 = arith.constant 16 : i32
    %17 = vector.broadcast %c16_i32 : i32 to vector<24x128xi32>
    %18 = arith.shrsi %0, %17 : vector<24x128xi32>
    %c255_i32_7 = arith.constant 255 : i32
    %19 = vector.broadcast %c255_i32_7 : i32 to vector<24x128xi32>
    %20 = arith.andi %18, %19 : vector<24x128xi32>
    %21 = arith.sitofp %20 : vector<24x128xi32> to vector<24x128xf32>
    %c2 = arith.constant 2 : index
    %c0_8 = arith.constant 0 : index
    %c0_9 = arith.constant 0 : index
    %22 = vector.load %arg2[%c2, %c0_8, %c0_9] : memref<4x24x128xf32, #tpu.memory_space<vmem>>, vector<1x24x128xf32>
    %23 = vector.shape_cast %22 : vector<1x24x128xf32> to vector<24x128xf32>
    %24 = vector.shape_cast %21 : vector<24x128xf32> to vector<1x24x128xf32>
    tpu.vector_store %arg2[%c2, %c0_8, %c0_9], %24 {strides = array<i32>} : memref<4x24x128xf32, #tpu.memory_space<vmem>>, vector<1x24x128xf32>,
    %c24_i32 = arith.constant 24 : i32
    %25 = vector.broadcast %c24_i32 : i32 to vector<24x128xi32>
    %26 = arith.shrsi %0, %25 : vector<24x128xi32>
    %c255_i32_10 = arith.constant 255 : i32
    %27 = vector.broadcast %c255_i32_10 : i32 to vector<24x128xi32>
    %28 = arith.andi %26, %27 : vector<24x128xi32>
    %29 = arith.sitofp %28 : vector<24x128xi32> to vector<24x128xf32>
    %c3 = arith.constant 3 : index
    %c0_11 = arith.constant 0 : index
    %c0_12 = arith.constant 0 : index
    %30 = vector.load %arg2[%c3, %c0_11, %c0_12] : memref<4x24x128xf32, #tpu.memory_space<vmem>>, vector<1x24x128xf32>
    %31 = vector.shape_cast %30 : vector<1x24x128xf32> to vector<24x128xf32>
    %32 = vector.shape_cast %29 : vector<24x128xf32> to vector<1x24x128xf32>
    tpu.vector_store %arg2[%c3, %c0_11, %c0_12], %32 {strides = array<i32>} : memref<4x24x128xf32, #tpu.memory_space<vmem>>, vector<1x24x128xf32>,
    return
  }
  func.func @transform_0(%arg0: i32) -> (i32, i32) {
    %c0_i32 = arith.constant 0 : i32
    %c0_i32_0 = arith.constant 0 : i32
    return %arg0, %c0_i32 : i32, i32
  }
  func.func @transform_1(%arg0: i32) -> (i32, i32, i32) {
    %c0_i32 = arith.constant 0 : i32
    %c0_i32_0 = arith.constant 0 : i32
    %c0_i32_1 = arith.constant 0 : i32
    return %c0_i32, %arg0, %c0_i32_0 : i32, i32, i32
  }
}

</mosaic_0001>

<bundles_post_ra>
// kernel: tpu_custom_call.1
= control target key start
LH: loop header
LB: loop body
LE: loop exit
PB: predicated region body
PF: predicated region fallthrough
CT: control target
= control target key end

     0   :  { %6 = vsyncpa [#allocation3], 0  ;;  %s622_s0 = inlined_call_operand.hbm [shape: s32[96,128], index: 0, kind: input, shape index: {}]   ;;  %s623_s1 = inlined_call_operand.hbm [shape: f32[4,96,128], index: 1, kind: output, shape index: {}]  }
   0x1   :  { %8 = vsyncpa [#allocation3 + $0x1], 0 }
   0x2   :  { %9 = vsyncpa [#allocation4], 0 }
   0x3   :  { %11 = vsyncpa [#allocation4 + $0x1], 0  ;;  %s472_s6 = smov 0   ;;  %s474_s7 = smov 0  }
   0x4   :  { %s476_s8 = smov 0   ;;  %s478_s9 = smov 0  }
   0x5 LB: > { %s493_s10 = sadd.s32 4294967295, %s450_s9   ;;  %s298_s11 = sadd.s32 4294967294, %s450_s9   ;;  %s450_s9 = sphi %s478_s9, %s636_s9   ;;  %s446_s8 = sphi %s476_s8, %s635_s8   ;;  %s442_s7 = sphi %s474_s7, %s634_s7   ;;  %s438_s6 = sphi %s472_s6, %s633_s6  }
   0x6   : > { %s497_s12 = sadd.s32 1, %s450_s9   ;;  %s24_s13 = sadd.s32 1, %s446_s8 }
   0x7   : > { %s21_s14 = ssub.s32 %s450_s9, %s497_s12  ;;  %p31_p0 = scmp.ne.s32.totalorder %s446_s8, %s442_s7 }
   0x8   : > { %p22_p1 = scmp.eq.s32.totalorder %s21_s14, 0  ;;  %p32_p2 = scmp.eq.s32.totalorder %s450_s9, 0 }
   0x9   : > { %p37_p3 = scmp.ne.s32.totalorder %s442_s7, %s438_s6  ;;  %p38_p4 = scmp.eq.s32.totalorder %s493_s10, 0 }
   0xa   : > { %s509_s15 = scalar_select %p22_p1, %s446_s8, %s24_s13  }
   0xb   : > { %p33_p5 = por %p32_p2, %p31_p0  ;;  %p511_p6 = por %p38_p4, %p37_p3 }
   0xc   : > { %p61_p7 = scmp.eq.s32.totalorder %s493_s10, 3  ;;  %p67_p8 = scmp.eq.s32.totalorder %s298_s11, 3 }
   0xd   : > { %s626_s16 = scalar_select %p511_p6, 1, 0 }
   0xe   : > { %p341_p9 = scmp.lt.s32.totalorder %s450_s9, 4  ;;  %p517_p10 = por %p61_p7, %p31_p0 }
   0xf   : > { %p521_p11 = por %p67_p8, %p37_p3  ;;  %s87_s19 = sand.u32 1, %s446_s8  }
  0x10   : > { %s627_s17 = scalar_select %p517_p10, 1, 0 }
  0x11   : > { %s628_s18 = scalar_select %p521_p11, 1, 0 }
  0x12   : > { %s318_s20 = smul.u32 384, %s450_s9  ;;  %p532_p12 = pnand %p341_p9, %p33_p5 }
  0x13   : > { %s320_s21 = smul.u32 24, %s87_s19  ;;  %s538_s28 = scalar_lea.sflag [#allocation3], %s87_s19 }
  0x14   : > { %s530_s24 = scalar_lea.hbm %s622_s0, %s318_s20  ;;  %p386_p0 = pneg %p532_p12 }
  0x15   : > { %s91_s26 = scalar_lea.vmem [#allocation2], %s320_s21  ;;  %s384_s29 = scalar_lea.hbm %s530_s24, 384 }
  0x16   : > { %s98_s27 = sshll.u32 %s91_s26, 4  ;;  %p385_p13 = scmp.ne.s32.totalorder %s530_s24, %s384_s29  ;;  %s536_s27 = int_to_ptr.vmem [resolvable:$true] %s98_s27 }
  0x17   : > { %s389_s3 = scalar_lea.hbm %s622_s0, 1536  ;;  %p390_p3 = scmp.lt.s32.totalorder %s530_s24, %s622_s0 }
  0x18   : > { %p387_p1 = pnand %p386_p0, %p385_p13  ;;  %p391_p4 = scmp.lt.s32.totalorder %s389_s3, %s384_s29 }
  0x1a   : > { %p388_p2 = pneg %p387_p1  ;;  %p392_p5 = por %p391_p4, %p390_p3 }
  0x1c   : > { %p393_p7 = pnand %p392_p5, %p388_p2 }
  0x1e   : > { %396 = shalt.err (!%p393_p7)
}
  0x1f   : > { %s397_s11 = scalar_lea.vmem %s536_s27, 384  ;;  %s452_s13 = smov [#allocation2]  }
  0x20   : > { %p398_p8 = scmp.ne.s32.totalorder %s536_s27, %s397_s11  ;;  %s402_s14 = sshll.u32 %s452_s13, 4  ;;  %s403_s14 = int_to_ptr.vmem [resolvable:$false] %s402_s14 }
  0x21   : > { %s404_s19 = scalar_lea.vmem %s403_s14, 768  ;;  %p405_p1 = scmp.lt.s32.totalorder %s536_s27, %s403_s14 }
  0x22   : > { %p400_p9 = pnand %p398_p8, %p386_p0  ;;  %p406_p11 = scmp.lt.s32.totalorder %s404_s19, %s397_s11 }
  0x24   : > { %p401_p13 = pneg %p400_p9  ;;  %p407_p10 = por %p406_p11, %p405_p1 }
  0x26   : > { %p408_p6 = pnand %p407_p10, %p401_p13 }
  0x28   : > { %411 = shalt.err (!%p408_p6)
}
  0x29   : > { %s453_s20 = smov 128   ;;  %s454_s21 = smov 8  }
  0x2a   : > { %336 = dma.hbm_to_vmem [thread:$0]  (!%p532_p12), %s530_s24, 384, %s536_s27, %s538_s28, %s453_s20, %s453_s20, %s454_s21  }
  0x2b   : > { %p302_p0 = scmp.ge.s32.totalorder %s450_s9, 1  ;;  %p106_p2 = scmp.lt.s32.totalorder %s450_s9, 5 }
  0x2d   : > { %p107_p3 = pnand %p302_p0, %p106_p2 }
  0x2e   : > { %s562_s22 = sand.u32 (!%p107_p3), 1, %s442_s7   ;;  %p630_p6 = scmp.ne.s32.totalorder (!%p107_p3), %s626_s16, 0 }
  0x2f   : > { %110 = sbr.rel (%p107_p3) target bundleno = 75 (0x4b), region = 24  ;;  %s113_s26 = scalar_lea.sflag (!%p107_p3), [#allocation3], %s562_s22 }
  0x30   : > { %s321_s23 = smul.u32 (!%p107_p3), 24, %s562_s22 }
  0x32   : > { %s116_s29 = scalar_lea.vmem (!%p107_p3), [#allocation2], %s321_s23 }
  0x34   : > { %429 = dma.done.wait (%p630_p6), %s113_s26, 384  }
  0x35   : > { %431 = vsyncadd (%p630_p6), %s113_s26, 4294966912  ;;  %s322_s24 = smul.u32 96, %s562_s22  ;;  %v137_v0 = vld [vmem:[%s116_s29] sm:$0xff]  ;;  %v138_v1 = vld [vmem:[%s116_s29 + $0x8] sm:$0xff]  ;;  %s189_s25 = scalar_lea.sflag [#allocation4], %s562_s22 }
  0x36   : > { %v139_v2 = vld [vmem:[%s116_s29 + $0x10] sm:$0xff]  ;;  %v140_v3 = vand.u32 255, %v137_v0  ;;  %v141_v4 = vand.u32 255, %v138_v1  ;;  %v149_v6 = vshra.s32 %v137_v0, 8  ;;  %v150_v7 = vshra.s32 %v138_v1, 8 }
  0x37   : > { %v142_v5 = vand.u32 255, %v139_v2  ;;  %v151_v8 = vshra.s32 %v139_v2, 8  ;;  %v162_v9 = vshra.s32 %v137_v0, 16  ;;  %v163_v10 = vshra.s32 %v138_v1, 16  ;;  %s571_s16 = scalar_lea.vmem [#allocation5], %s322_s24 }
  0x38   : > { %v143_v11 = vcvt.s32.f32 %v140_v3  ;;  %v144_v12 = vcvt.s32.f32 %v141_v4  ;;  %v152_v14 = vand.u32 255, %v149_v6  ;;  %v153_v15 = vand.u32 255, %v150_v7 }
  0x39   : > { %v145_v13 = vcvt.s32.f32 %v142_v5  ;;  %v154_v16 = vand.u32 255, %v151_v8  ;;  %v165_v17 = vand.u32 255, %v162_v9  ;;  %v166_v18 = vand.u32 255, %v163_v10 }
  0x3a   : > { %146 = vst [vmem:[%s571_s16] sm:$0xff] %v143_v11  ;;  %147 = vst [vmem:[%s571_s16 + $0x8] sm:$0xff] %v144_v12  ;;  %v155_v19 = vcvt.s32.f32 %v152_v14  ;;  %v164_v20 = vshra.s32 %v139_v2, 16  ;;  %v309_v21 = vshrl.u32 %v137_v0, 24  ;;  %v310_v22 = vshrl.u32 %v138_v1, 24 }
  0x3b   : > { %148 = vst [vmem:[%s571_s16 + $0x10] sm:$0xff] %v145_v13  ;;  %v156_v23 = vcvt.s32.f32 %v153_v15  ;;  %v157_v24 = vcvt.s32.f32 %v154_v16  ;;  %v168_v25 = vcvt.s32.f32 %v165_v17  ;;  %v169_v26 = vcvt.s32.f32 %v166_v18 }
  0x3c   : > { %303 = vst [vmem:[%s571_s16 + $0x18] sm:$0xff] %v155_v19  ;;  %v167_v27 = vand.u32 255, %v164_v20  ;;  %v181_v28 = vcvt.s32.f32 %v309_v21  ;;  %v182_v29 = vcvt.s32.f32 %v310_v22  ;;  %v311_v30 = vshrl.u32 %v139_v2, 24 }
  0x3d   : > { %304 = vst [vmem:[%s571_s16 + $0x20] sm:$0xff] %v156_v23  ;;  %305 = vst [vmem:[%s571_s16 + $0x28] sm:$0xff] %v157_v24 }
  0x3e   : > { %306 = vst [vmem:[%s571_s16 + $0x30] sm:$0xff] %v168_v25  ;;  %307 = vst [vmem:[%s571_s16 + $0x38] sm:$0xff] %v169_v26  ;;  %v170_v31 = vcvt.s32.f32 %v167_v27  ;;  %v183_v32 = vcvt.s32.f32 %v311_v30 }
  0x3f   : > { %312 = vst [vmem:[%s571_s16 + $0x48] sm:$0xff] %v181_v28  ;;  %313 = vst [vmem:[%s571_s16 + $0x50] sm:$0xff] %v182_v29 }
  0x40   : > { %308 = vst [vmem:[%s571_s16 + $0x40] sm:$0xff] %v170_v31  ;;  %314 = vst [vmem:[%s571_s16 + $0x58] sm:$0xff] %v183_v32 }
  0x41   : > { %s319_s27 = smul.u32 384, %s493_s10  ;;  %s212_s28 = sshll.u32 %s571_s16, 4  ;;  %s213_s28 = int_to_ptr.vmem [resolvable:$true] %s212_s28 }
  0x42   : > { %s455_s4 = smov 384   ;;  %p631_p10 = scmp.ne.s32.totalorder %s627_s17, 0 }
  0x43   : > { %s201_s3 = scalar_lea.hbm %s623_s1, %s319_s27  ;;  %s456_s5 = smov 1536  }
  0x44   : > { %325 = sst [smem:[#allocation7]] (%p631_p10), %s455_s4  ;;  %s457_s11 = smov 3  }
  0x45   : > { %326 = sst [smem:[#allocation7 + $0x1]] (%p631_p10), %s456_s5  ;;  %s458_s13 = smov 128  }
  0x46   : > { %327 = sst [smem:[#allocation7 + $0x2]] (%p631_p10), %s457_s11  ;;  %s459_s10 = smov 8  }
  0x47   : > { %328 = sst [smem:[#allocation7 + $0x3]] (%p631_p10), %s458_s13  ;;  %s460_s14 = smov 131072  }
  0x48   : > { %329 = sst [smem:[#allocation7 + $0x4]] (%p631_p10), %s458_s13  ;;  %s461_s19 = smov 0  }
  0x49   : > { %330 = sst [smem:[#allocation7 + $0x5]] (%p631_p10), %s459_s10 }
  0x4a   : > { %331 = dma.general (%p631_p10), %s213_s28, 1536, %s201_s3, %s189_s25, %s460_s14, [#allocation7], %s461_s19, 0  }
  0x4b PF: > { %p342_p11 = scmp.ge.s32.totalorder %s450_s9, 2  ;;  %s240_s20 = sand.u32 1, %s438_s6  }
  0x4c   : > { %p632_p12 = scmp.ne.s32.totalorder %s628_s18, 0  ;;  %s241_s21 = scalar_lea.sflag [#allocation4], %s240_s20 }
  0x4e   : > { %p338_p4 = pnand %p342_p11, %p632_p12 }
  0x50   : > { %p339_p5 = pneg %p338_p4 }
  0x52   : > { %433 = dma.done.wait (%p339_p5), %s241_s21, 1536  }
  0x53   : > { %435 = vsyncadd (%p339_p5), %s241_s21, 4294965760  ;;  %p14_p7 = scmp.ge.s32.totalorder %s497_s12, 6   ;;  %s633_s6 = smov %s442_s7 }
  0x54   : > { %s634_s7 = smov %s446_s8  ;;  %s635_s8 = smov %s509_s15 }
  0x55   : > { %s636_s9 = smov %s497_s12  ;;  %16 = sbr.rel (!%p14_p7) target bundleno = 5 (0x5), region = 77 }
  0x5a   :  { %246 = vsyncpa [#allocation3], 1 }
  0x5b   :  { %248 = vsyncpa [#allocation3 + $0x1], 1 }
  0x5c   :  { %249 = vsyncpa [#allocation4], 1 }
  0x5d   :  { %251 = vsyncpa [#allocation4 + $0x1], 1 }

</bundles_post_ra>
